<compile_context>
chip_gen: v7x
topology: tpu7x:2x2x1
jax: 0.10.0
libtpu: 0.0.40
codegen_flags: <defaults>
</compile_context>

<pallas_src>
import math
import numpy as np
import jax
import jax.numpy as jnp
from jax.experimental import pallas as pl
from jax.experimental.pallas import tpu as pltpu


def drug_memory_kernel(adj_ref, w_ref, b_ref, out_ref):
    """Single-invocation fused dual-GCN.

    adj_ref: (2N, 2N) bf16 block-diag [ehr_adj, 0; 0, ddi_adj]
    w_ref:   (3, 2N, Ep) bf16: [W1 row-stacked (ehr|ddi), W2_ehr, -inter*W2_ddi]
    b_ref:   (2, 2N, Ep) f32:  [b1 rows (ehr|ddi), b2 rows (ehr| -inter*ddi)]
    out_ref: (N, Ep) f32 = drug_memory (lane-padded embedding dim).
    """
    n = out_ref.shape[0]
    adj = adj_ref[...]                                      # (2N, 2N) bf16

    # --- Layer 1, both GCNs in one full-M MXU pass:
    #     h = relu(adj_bd @ W1_stacked + b1)   (x = I folded away)
    h = jnp.dot(adj, w_ref[0], preferred_element_type=jnp.float32)
    h = jnp.maximum(h + b_ref[0], 0.0)                      # f32 bias + ReLU (VPU)
    # TODO(synk): nn.Dropout(p=0.3) is identity in eval mode; training-mode
    # stochastic dropout (pltpu.prng_*) intentionally not applied here.

    # --- Layer 2: per-GCN W2 (ddi's W2 already carries the -inter factor).
    hb = h.astype(jnp.bfloat16)
    s_ehr = jnp.dot(hb[:n], w_ref[1], preferred_element_type=jnp.float32)
    s_ddi = jnp.dot(hb[n:], w_ref[2], preferred_element_type=jnp.float32)
    s = jnp.concatenate([s_ehr, s_ddi], axis=0)             # (2N, Ep) f32

    # --- Final propagation, one full-M MXU pass; s stays f32 (no second
    #     quantization of the intermediate).
    out = jnp.dot(adj.astype(jnp.float32), s,
                  preferred_element_type=jnp.float32) + b_ref[1]

    # drug_memory = ehr_out + (-inter) * ddi_out   (scale already folded in)
    out_ref[...] = out[:n] + out[n:]


def fused_gcn_drug_memory(adj_bd, w_pack, b_pack):
    """adj_bd: (2N, 2N) bf16; w_pack: (3, 2N, Ep) bf16; b_pack: (2, 2N, Ep) f32.
    Returns (N, Ep) f32 = ehr_gcn - inter * ddi_gcn (Ep lane-padded)."""
    two_n = adj_bd.shape[0]
    ep = w_pack.shape[-1]
    n = two_n // 2
    return pl.pallas_call(
        drug_memory_kernel,
        out_shape=jax.ShapeDtypeStruct((n, ep), jnp.float32),
        # Everything is tiny (<300 KB total) -> keep it all resident in VMEM,
        # single invocation, no grid, no pipelining.
        in_specs=[
            pl.BlockSpec(memory_space=pltpu.MemorySpace.VMEM),  # adj_bd
            pl.BlockSpec(memory_space=pltpu.MemorySpace.VMEM),  # w_pack
            pl.BlockSpec(memory_space=pltpu.MemorySpace.VMEM),  # b_pack
        ],
        out_specs=pl.BlockSpec(memory_space=pltpu.MemorySpace.VMEM),
    )(adj_bd, w_pack, b_pack)


def row_normalize(mx):
    """Row-normalize matrix (matches GCN.normalize)."""
    rowsum = np.array(mx.sum(1))
    r_inv = np.power(rowsum, -1.0).flatten()
    r_inv[np.isinf(r_inv)] = 0.0
    r_mat_inv = np.diagflat(r_inv)
    return r_mat_inv.dot(mx)


if __name__ == "__main__":
    voc_size = 64      # vocab_size[2] (medication vocab), small toy size
    emb_dim = 32       # GCN embedding dim
    E_PAD = 128        # lane-dense padded embedding dim
    M = 2 * voc_size   # block-diag packed M dimension (ehr rows | ddi rows)

    key = jax.random.PRNGKey(0)
    keys = jax.random.split(key, 6)

    # Two synthetic binary adjacencies (ehr + ddi), then self-loops +
    # row-normalize exactly as GCN.__init__ does.
    def make_adj(k):
        raw = (jax.random.uniform(k, (voc_size, voc_size)) > 0.8).astype(jnp.float32)
        a = np.asarray(raw) + np.eye(voc_size, dtype=np.float32)
        return jnp.asarray(row_normalize(a), dtype=jnp.float32)

    ehr_adj = make_adj(keys[0])
    ddi_adj = make_adj(keys[1])

    # GraphConvolution params: uniform(-stdv, stdv), stdv = 1/sqrt(out_features).
    def init_gcn_params(k):
        kw1, kb1, kw2, kb2 = jax.random.split(k, 4)
        stdv = 1.0 / math.sqrt(emb_dim)
        w1 = jax.random.uniform(kw1, (voc_size, emb_dim), minval=-stdv, maxval=stdv,
                                dtype=jnp.float32)
        b1 = jax.random.uniform(kb1, (1, emb_dim), minval=-stdv, maxval=stdv,
                                dtype=jnp.float32)
        w2 = jax.random.uniform(kw2, (emb_dim, emb_dim), minval=-stdv, maxval=stdv,
                                dtype=jnp.float32)
        b2 = jax.random.uniform(kb2, (1, emb_dim), minval=-stdv, maxval=stdv,
                                dtype=jnp.float32)
        return w1, b1, w2, b2

    ehr_params = init_gcn_params(keys[2])
    ddi_params = init_gcn_params(keys[3])

    # GAMENet's self.inter: uniform(-0.1, 0.1)
    inter = jax.random.uniform(keys[4], (), minval=-0.1, maxval=0.1, dtype=jnp.float32)
    neg_inter = -inter

    # --- host-side packing -------------------------------------------------
    # Zero-pad E 32 -> 128 (padded cols stay exactly zero through both layers),
    # block-diag pack adj, row-stack W1, fold -inter into ddi's W2 / b2 (in
    # f32, before the bf16 cast), and consolidate everything into 3 arrays.
    def pad_cols(a, ep):
        return jnp.pad(a, ((0, 0), (0, ep - a.shape[1])))

    def pad_w2(w2, ep):
        return jnp.pad(w2, ((0, ep - w2.shape[0]), (0, ep - w2.shape[1])))

    w1e, b1e, w2e, b2e = ehr_params
    w1d, b1d, w2d, b2d = ddi_params

    adj_bd = jnp.zeros((M, M), jnp.float32)
    adj_bd = adj_bd.at[:voc_size, :voc_size].set(ehr_adj)
    adj_bd = adj_bd.at[voc_size:, voc_size:].set(ddi_adj)
    adj_bd = adj_bd.astype(jnp.bfloat16)                               # (2N, 2N)

    w1_stacked = jnp.concatenate(
        [pad_cols(w1e, E_PAD), pad_cols(w1d, E_PAD)], axis=0)          # (2N, Ep)
    w2e_p = pad_w2(w2e, E_PAD)                                         # (Ep, Ep)
    w2d_p = pad_w2(w2d, E_PAD) * neg_inter                             # fold -inter
    w_pack = jnp.stack([w1_stacked, w2e_p, w2d_p]).astype(jnp.bfloat16)  # (3, 2N, Ep)

    b1_full = jnp.concatenate(
        [jnp.broadcast_to(pad_cols(b1e, E_PAD), (voc_size, E_PAD)),
         jnp.broadcast_to(pad_cols(b1d, E_PAD), (voc_size, E_PAD))], axis=0)
    b2_full = jnp.concatenate(
        [jnp.broadcast_to(pad_cols(b2e, E_PAD), (voc_size, E_PAD)),
         jnp.broadcast_to(pad_cols(b2d, E_PAD), (voc_size, E_PAD)) * neg_inter],
        axis=0)
    b_pack = jnp.stack([b1_full, b2_full]).astype(jnp.float32)         # (2, 2N, Ep)

    # --- run the fused kernel ----------------------------------------------
    drug_memory_pad = fused_gcn_drug_memory(adj_bd, w_pack, b_pack)
    drug_memory_pad = jax.block_until_ready(drug_memory_pad)
    drug_memory = drug_memory_pad[:, :emb_dim]                         # (N, E)

    # --- pure-JAX f32 reference (eval-mode dropout = identity) --------------
    def gcn_ref(adj, params):
        w1, b1, w2, b2 = params
        h = jnp.maximum(adj @ w1 + b1, 0.0)
        return adj @ (h @ w2) + b2

    ref = gcn_ref(ehr_adj, ehr_params) - inter * gcn_ref(ddi_adj, ddi_params)

    assert drug_memory.shape == (voc_size, emb_dim)
    # Tolerance accounts for bf16 MXU operands (f32 accumulation throughout).
    np.testing.assert_allclose(np.asarray(drug_memory), np.asarray(ref),
                               rtol=2e-2, atol=2e-2)

    print("KERNEL_OK")
</pallas_src>

<mosaic_0001>
module attributes {stable_mosaic.version = 11 : i64} {
  func.func @drug_memory_kernel(%arg0: memref<128x128xbf16, #tpu.memory_space<vmem>>, %arg1: memref<3x128x128xbf16, #tpu.memory_space<vmem>>, %arg2: memref<2x128x128xf32, #tpu.memory_space<vmem>>, %arg3: memref<64x128xf32, #tpu.memory_space<vmem>>) attributes {dimension_semantics = [], scalar_prefetch = 0 : i64, scratch_operands = 0 : i64, tpu.core_type = #tpu.core_type<tc>} {
    %c0 = arith.constant 0 : index
    %c0_0 = arith.constant 0 : index
    %0 = vector.load %arg0[%c0, %c0_0] : memref<128x128xbf16, #tpu.memory_space<vmem>>, vector<128x128xbf16>
    %c0_1 = arith.constant 0 : index
    %c0_2 = arith.constant 0 : index
    %c0_3 = arith.constant 0 : index
    %1 = vector.load %arg1[%c0_1, %c0_2, %c0_3] : memref<3x128x128xbf16, #tpu.memory_space<vmem>>, vector<1x128x128xbf16>
    %2 = vector.shape_cast %1 : vector<1x128x128xbf16> to vector<128x128xbf16>
    %cst = arith.constant dense<0.000000e+00> : vector<128x128xf32>
    %3 = tpu.matmul %0, %2, %cst {dimension_numbers = #tpu.dot_dimension_numbers<[1], [0], [0], [1], [0, 0, 1, 1], [], []>} : vector<128x128xbf16>, vector<128x128xbf16>, vector<128x128xf32> -> vector<128x128xf32>
    %c0_4 = arith.constant 0 : index
    %c0_5 = arith.constant 0 : index
    %c0_6 = arith.constant 0 : index
    %4 = vector.load %arg2[%c0_4, %c0_5, %c0_6] : memref<2x128x128xf32, #tpu.memory_space<vmem>>, vector<1x128x128xf32>
    %5 = vector.shape_cast %4 : vector<1x128x128xf32> to vector<128x128xf32>
    %6 = arith.addf %3, %5 : vector<128x128xf32>
    %cst_7 = arith.constant 0.000000e+00 : f32
    %7 = vector.broadcast %cst_7 : f32 to vector<128x128xf32>
    %8 = arith.maximumf %6, %7 : vector<128x128xf32>
    %9 = arith.truncf %8 : vector<128x128xf32> to vector<128x128xbf16>
    %10 = vector.extract_strided_slice %9 {offsets = [0, 0], sizes = [64, 128], strides = [1, 1]} : vector<128x128xbf16> to vector<64x128xbf16>
    %c1 = arith.constant 1 : index
    %c0_8 = arith.constant 0 : index
    %c0_9 = arith.constant 0 : index
    %11 = vector.load %arg1[%c1, %c0_8, %c0_9] : memref<3x128x128xbf16, #tpu.memory_space<vmem>>, vector<1x128x128xbf16>
    %12 = vector.shape_cast %11 : vector<1x128x128xbf16> to vector<128x128xbf16>
    %cst_10 = arith.constant dense<0.000000e+00> : vector<64x128xf32>
    %13 = tpu.matmul %10, %12, %cst_10 {dimension_numbers = #tpu.dot_dimension_numbers<[1], [0], [0], [1], [0, 0, 1, 1], [], []>} : vector<64x128xbf16>, vector<128x128xbf16>, vector<64x128xf32> -> vector<64x128xf32>
    %14 = vector.extract_strided_slice %9 {offsets = [64, 0], sizes = [64, 128], strides = [1, 1]} : vector<128x128xbf16> to vector<64x128xbf16>
    %c2 = arith.constant 2 : index
    %c0_11 = arith.constant 0 : index
    %c0_12 = arith.constant 0 : index
    %15 = vector.load %arg1[%c2, %c0_11, %c0_12] : memref<3x128x128xbf16, #tpu.memory_space<vmem>>, vector<1x128x128xbf16>
    %16 = vector.shape_cast %15 : vector<1x128x128xbf16> to vector<128x128xbf16>
    %cst_13 = arith.constant dense<0.000000e+00> : vector<64x128xf32>
    %17 = tpu.matmul %14, %16, %cst_13 {dimension_numbers = #tpu.dot_dimension_numbers<[1], [0], [0], [1], [0, 0, 1, 1], [], []>} : vector<64x128xbf16>, vector<128x128xbf16>, vector<64x128xf32> -> vector<64x128xf32>
    %18 = tpu.concatenate %13, %17 in 0 : vector<64x128xf32>, vector<64x128xf32> -> vector<128x128xf32>
    %19 = arith.extf %0 : vector<128x128xbf16> to vector<128x128xf32>
    %cst_14 = arith.constant dense<0.000000e+00> : vector<128x128xf32>
    %20 = tpu.matmul %19, %18, %cst_14 {dimension_numbers = #tpu.dot_dimension_numbers<[1], [0], [0], [1], [0, 0, 1, 1], [], []>} : vector<128x128xf32>, vector<128x128xf32>, vector<128x128xf32> -> vector<128x128xf32>
    %c1_15 = arith.constant 1 : index
    %c0_16 = arith.constant 0 : index
    %c0_17 = arith.constant 0 : index
    %21 = vector.load %arg2[%c1_15, %c0_16, %c0_17] : memref<2x128x128xf32, #tpu.memory_space<vmem>>, vector<1x128x128xf32>
    %22 = vector.shape_cast %21 : vector<1x128x128xf32> to vector<128x128xf32>
    %23 = arith.addf %20, %22 : vector<128x128xf32>
    %24 = vector.extract_strided_slice %23 {offsets = [0, 0], sizes = [64, 128], strides = [1, 1]} : vector<128x128xf32> to vector<64x128xf32>
    %25 = vector.extract_strided_slice %23 {offsets = [64, 0], sizes = [64, 128], strides = [1, 1]} : vector<128x128xf32> to vector<64x128xf32>
    %26 = arith.addf %24, %25 : vector<64x128xf32>
    %c0_18 = arith.constant 0 : index
    %c0_19 = arith.constant 0 : index
    %27 = vector.load %arg3[%c0_18, %c0_19] : memref<64x128xf32, #tpu.memory_space<vmem>>, vector<64x128xf32>
    tpu.vector_store %arg3[%c0_18, %c0_19], %26 {strides = array<i32>} : memref<64x128xf32, #tpu.memory_space<vmem>>, vector<64x128xf32>,
    return
  }
}

</mosaic_0001>

<bundles_post_ra>
// kernel: tpu_custom_call.1
= control target key start
LH: loop header
LB: loop body
LE: loop exit
PB: predicated region body
PF: predicated region fallthrough
CT: control target
= control target key end

     0   :  { %8 = vsyncpa [#allocation3], 0  ;;  %s1361_s0 = inlined_call_operand.hbm [shape: bf16[128,128], index: 0, kind: input, shape index: {}]   ;;  %s1362_s1 = inlined_call_operand.hbm [shape: bf16[3,128,128], index: 1, kind: input, shape index: {}]   ;;  %s1363_s2 = inlined_call_operand.hbm [shape: f32[2,128,128], index: 2, kind: input, shape index: {}]   ;;  %s1364_s3 = inlined_call_operand.hbm [shape: f32[64,128], index: 3, kind: output, shape index: {}]  }
   0x1   :  { %9 = vsyncpa [#allocation6], 0 }
   0x2   :  { %10 = vsyncpa [#allocation4], 0  ;;  %s1232_s12 = smov [#allocation5]   ;;  %s1233_s14 = smov [#allocation2]  }
   0x3   :  { %s28_s13 = sshll.u32 %s1232_s12, 4  ;;  %s16_s15 = sshll.u32 %s1233_s14, 4  ;;  %s29_s13 = int_to_ptr.vmem [resolvable:$true] %s28_s13  ;;  %s1260_s15 = int_to_ptr.vmem [resolvable:$true] %s16_s15 }
   0x4   :  { %s1138_s18 = scalar_lea.hbm %s1362_s1, 3072 }
   0x5   :  { %p1139_p0 = scmp.ne.s32.totalorder %s1362_s1, %s1138_s18  ;;  %p1142_p1 = scmp.lt.u32.totalorder %s1138_s18, %s1362_s1 }
   0x7   :  { %p1144_p2 = pnand %p1142_p1, %p1139_p0 }
   0x9   :  { %1147 = shalt.err (!%p1144_p2)
}
   0xa   :  { %s1148_s23 = scalar_lea.vmem %s29_s13, 3072  ;;  %p1153_p4 = scmp.lt.s32.totalorder %s29_s13, %s29_s13 }
   0xb   :  { %p1149_p3 = scmp.ne.s32.totalorder %s29_s13, %s1148_s23  ;;  %p1154_p5 = scmp.lt.s32.totalorder %s1148_s23, %s1148_s23 }
   0xd   :  { %p1155_p6 = por %p1154_p5, %p1153_p4 }
   0xf   :  { %p1156_p7 = pnand %p1155_p6, %p1149_p3 }
  0x11   :  { %1159 = shalt.err (!%p1156_p7)
}
  0x12   :  { %s1234_s24 = smov 64   ;;  %s1235_s25 = smov 4  }
  0x13   :  { %34 = dma.hbm_to_vmem [thread:$0]  %s1362_s1, 3072, %s29_s13, [#allocation6], %s1234_s24, %s1234_s24, %s1235_s25  }
  0x14   :  { %s1160_s30 = scalar_lea.hbm %s1361_s0, 1024 }
  0x15   :  { %p1161_p8 = scmp.ne.s32.totalorder %s1361_s0, %s1160_s30  ;;  %p1164_p9 = scmp.lt.u32.totalorder %s1160_s30, %s1361_s0 }
  0x17   :  { %p1166_p10 = pnand %p1164_p9, %p1161_p8 }
  0x19   :  { %1169 = shalt.err (!%p1166_p10)
}
  0x1a   :  { %s1170_s8 = scalar_lea.vmem %s1260_s15, 1024  ;;  %p1175_p12 = scmp.lt.s32.totalorder %s1260_s15, %s1260_s15 }
  0x1b   :  { %p1171_p11 = scmp.ne.s32.totalorder %s1260_s15, %s1170_s8  ;;  %p1176_p13 = scmp.lt.s32.totalorder %s1170_s8, %s1170_s8 }
  0x1d   :  { %p1177_p0 = por %p1176_p13, %p1175_p12 }
  0x1f   :  { %p1178_p1 = pnand %p1177_p0, %p1171_p11 }
  0x21   :  { %1181 = shalt.err (!%p1178_p1)
}
  0x22   :  { %22 = dma.hbm_to_vmem [thread:$0]  %s1361_s0, 1024, %s1260_s15, [#allocation3], %s1234_s24, %s1234_s24, %s1235_s25  }
  0x23   :  { %s1236_s10 = smov [#allocation7]   ;;  %s1182_s14 = scalar_lea.hbm %s1363_s2, 4096 }
  0x24   :  { %s40_s11 = sshll.u32 %s1236_s10, 4  ;;  %p1183_p2 = scmp.ne.s32.totalorder %s1363_s2, %s1182_s14  ;;  %s41_s11 = int_to_ptr.vmem [resolvable:$true] %s40_s11 }
  0x25   :  { %p1186_p3 = scmp.lt.u32.totalorder %s1182_s14, %s1363_s2 }
  0x27   :  { %p1188_p4 = pnand %p1186_p3, %p1183_p2 }
  0x29   :  { %1191 = shalt.err (!%p1188_p4)
}
  0x2a   :  { %s1192_s20 = scalar_lea.vmem %s41_s11, 4096  ;;  %p1197_p6 = scmp.lt.s32.totalorder %s41_s11, %s41_s11 }
  0x2b   :  { %p1193_p5 = scmp.ne.s32.totalorder %s41_s11, %s1192_s20  ;;  %p1198_p7 = scmp.lt.s32.totalorder %s1192_s20, %s1192_s20 }
  0x2d   :  { %p1199_p8 = por %p1198_p7, %p1197_p6 }
  0x2f   :  { %p1200_p9 = pnand %p1199_p8, %p1193_p5 }
  0x31   :  { %1203 = shalt.err (!%p1200_p9)
}
  0x32   :  { %s1237_s0 = smov 128   ;;  %s1238_s15 = smov 8  }
  0x33   :  { %46 = dma.hbm_to_vmem [thread:$0]  %s1363_s2, 4096, %s41_s11, [#allocation6], %s1237_s0, %s1237_s0, %s1238_s15  }
  0x34   :  { %1226 = dma.done.wait [#allocation3], 1024  }
  0x35   :  { %1227 = vsyncadd [#allocation3], 4294966272 }
  0x36   :  { %1228 = dma.done.wait [#allocation6], 7168  }
  0x37   :  { %1229 = vsyncadd [#allocation6], 4294960128  ;;  %v1098_v0 = vld [vmem:[#allocation5] sm:$0xff]   ;;  %v1099_v1 = vld [vmem:[#allocation5 + $0x8] sm:$0xff]   ;;  %s1239_s2 = smov [#allocation8]  }
  0x38   :  { %898 = vmatprep.subr.bf16.mxu0 %v1098_v0  ;;  %v1100_v2 = vld [vmem:[#allocation5 + $0x10] sm:$0xff]   ;;  %v1101_v3 = vld [vmem:[#allocation5 + $0x18] sm:$0xff]   ;;  %v1306_v4 = vld [vmem:[#allocation2] sm:$0xff]   ;;  %s781_s23 = sshll.u32 %s1239_s2, 4  ;;  %s782_s23 = int_to_ptr.vmem [resolvable:$true] %s781_s23 }
  0x39   :  { %899 = vmatpush3.bf16.msra.mxu0 %v1098_v0  ;;  %v1102_v5 = vld [vmem:[#allocation5 + $0x20] sm:$0xff]   ;;  %914 = vmatprep.mubr.bf16.mxu0 %v1306_v4  ;;  %v1115_v7 = vld [vmem:[#allocation5 + $0x48] sm:$0xff]   ;;  %v1116_v8 = vld [vmem:[#allocation5 + $0x50] sm:$0xff]   ;;  %s1204_s24 = scalar_lea.vmem %s782_s23, 1024  ;;  %p1209_p11 = scmp.lt.s32.totalorder %s782_s23, %s782_s23 }
  0x3a   :  { %900 = vmatprep.subr.bf16.mxu0 %v1099_v1  ;;  %v1114_v6 = vld [vmem:[#allocation5 + $0x40] sm:$0xff]   ;;  %v1103_v9 = vld [vmem:[#allocation5 + $0x28] sm:$0xff]   ;;  %v1104_v10 = vld [vmem:[#allocation5 + $0x30] sm:$0xff]   ;;  %p1205_p10 = scmp.ne.s32.totalorder %s782_s23, %s1204_s24  ;;  %p1210_p12 = scmp.lt.s32.totalorder %s1204_s24, %s1204_s24 }
  0x3b   :  { %930 = vmatprep.subr.bf16.mxu1 %v1114_v6  ;;  %v1117_v11 = vld [vmem:[#allocation5 + $0x58] sm:$0xff]   ;;  %v1119_v12 = vld [vmem:[#allocation5 + $0x60] sm:$0xff]   ;;  %v1309_v14 = vld [vmem:[#allocation2 + $0x8] sm:$0xff]  }
  0x3c   :  { %931 = vmatpush3.bf16.msra.mxu1 %v1114_v6  ;;  %v1105_v13 = vld [vmem:[#allocation5 + $0x38] sm:$0xff]   ;;  %v1121_v15 = vld [vmem:[#allocation5 + $0x68] sm:$0xff]   ;;  %v1311_v16 = vld [vmem:[#allocation2 + $0x10] sm:$0xff]   ;;  %v582_v6 = vunpack.c.l.bf16 %v1306_v4  ;;  %p1211_p13 = por %p1210_p12, %p1209_p11 }
  0x3d   :  { %901 = vmatpush3.bf16.msra.mxu0 %v1099_v1  ;;  %932 = vmatprep.subr.bf16.mxu1 %v1115_v7  ;;  %v1118_v17 = vld [vmem:[#allocation5 + $0x80] sm:$0xff]   ;;  %v1120_v18 = vld [vmem:[#allocation5 + $0x88] sm:$0xff]   ;;  %v1315_v19 = vld [vmem:[#allocation2 + $0x18] sm:$0xff]  }
  0x3e   :  { %902 = vmatprep.subr.bf16.mxu0 %v1100_v2  ;;  %v1317_v20 = vld [vmem:[#allocation2 + $0x20] sm:$0xff]   ;;  %v1321_v21 = vld [vmem:[#allocation2 + $0x28] sm:$0xff]   ;;  %v1323_v22 = vld [vmem:[#allocation2 + $0x30] sm:$0xff]   ;;  %p1212_p0 = pnand %p1211_p13, %p1205_p10 }
  0x3f   :  { %v1327_v23 = vld [vmem:[#allocation2 + $0x38] sm:$0xff]   ;;  %v1122_v24 = vld [vmem:[#allocation5 + $0x90] sm:$0xff]   ;;  %v1126_v28 = vld [vmem:[#allocation5 + $0xa0] sm:$0xff]  }
  0x40   :  { %933 = vmatpush3.bf16.msra.mxu1 %v1115_v7  ;;  %v1123_v25 = vld [vmem:[#allocation5 + $0x70] sm:$0xff]   ;;  %v1124_v26 = vld [vmem:[#allocation5 + $0x98] sm:$0xff]   ;;  %v1127_v29 = vld [vmem:[#allocation5 + $0xa8] sm:$0xff]  }
  0x41   :  { %903 = vmatpush3.bf16.msra.mxu0 %v1100_v2  ;;  %934 = vmatprep.subr.bf16.mxu1 %v1116_v8  ;;  %v1125_v27 = vld [vmem:[#allocation5 + $0x78] sm:$0xff]   ;;  %v1128_v30 = vld [vmem:[#allocation5 + $0xb0] sm:$0xff]   ;;  %v89_v33 = vld [vmem:[#allocation7] sm:$0xff] }
  0x42   :  { %904 = vmatprep.subr.bf16.mxu0 %v1101_v3  ;;  %v1129_v31 = vld [vmem:[#allocation5 + $0xb8] sm:$0xff]   ;;  %v91_v32 = vld [vmem:[#allocation7 + $0x10] sm:$0xff]  ;;  %v90_v38 = vld [vmem:[#allocation7 + $0x8] sm:$0xff] }
  0x43   :  { %v92_v35 = vld [vmem:[#allocation7 + $0x18] sm:$0xff]  ;;  %v95_v48 = vld [vmem:[#allocation7 + $0x30] sm:$0xff]  ;;  %v93_v50 = vld [vmem:[#allocation7 + $0x20] sm:$0xff] }
  0x44   :  { %935 = vmatpush3.bf16.msra.mxu1 %v1116_v8  ;;  %v96_v52 = vld [vmem:[#allocation7 + $0x38] sm:$0xff]  ;;  %v94_v56 = vld [vmem:[#allocation7 + $0x28] sm:$0xff]  ;;  %v99_v2 = vld [vmem:[#allocation7 + $0x50] sm:$0xff] }
  0x45   :  { %905 = vmatpush3.bf16.msra.mxu0 %v1101_v3  ;;  %936 = vmatprep.subr.bf16.mxu1 %v1117_v11 }
  0x46   :  { %906 = vmatprep.subr.bf16.mxu0 %v1102_v5 }
  0x48   :  { %937 = vmatpush3.bf16.msra.mxu1 %v1117_v11 }
  0x49   :  { %907 = vmatpush3.bf16.msra.mxu0 %v1102_v5  ;;  %938 = vmatprep.subr.bf16.mxu1 %v1119_v12  ;;  %v97_v5 = vld [vmem:[#allocation7 + $0x40] sm:$0xff] }
  0x4a   :  { %908 = vmatprep.subr.bf16.mxu0 %v1103_v9 }
  0x4c   :  { %939 = vmatpush3.bf16.msra.mxu1 %v1119_v12  ;;  %v98_v12 = vld [vmem:[#allocation7 + $0x48] sm:$0xff] }
  0x4d   :  { %909 = vmatpush3.bf16.msra.mxu0 %v1103_v9  ;;  %940 = vmatprep.subr.bf16.mxu1 %v1121_v15  ;;  %v100_v9 = vld [vmem:[#allocation7 + $0x58] sm:$0xff] }
  0x4e   :  { %910 = vmatprep.subr.bf16.mxu0 %v1104_v10 }
  0x50   :  { %941 = vmatpush3.bf16.msra.mxu1 %v1121_v15 }
  0x51   :  { %911 = vmatpush3.bf16.msra.mxu0 %v1104_v10  ;;  %942 = vmatprep.subr.bf16.mxu1 %v1123_v25 }
  0x52   :  { %912 = vmatprep.subr.bf16.mxu0 %v1105_v13 }
  0x54   :  { %943 = vmatpush3.bf16.msra.mxu1 %v1123_v25 }
  0x55   :  { %913 = vmatpush3.bf16.msra.mxu0 %v1105_v13  ;;  %944 = vmatprep.subr.bf16.mxu1 %v1125_v27 }
  0x56   :  { %954 = vmatprep.subr.bf16.mxu0 %v1118_v17 }
  0x58   :  { %915 = vmatmul.mubr.bf16.vlgmr.msra.gmra.mrb[0].mxu0 %v1309_v14  ;;  %945 = vmatpush3.bf16.msra.mxu1 %v1125_v27 }
  0x59   :  { %918 = vmatprep.mubr.bf16.mxu0 %v1311_v16  ;;  %955 = vmatpush3.bf16.msra.mxu0 %v1118_v17 }
  0x5a   :  { %956 = vmatprep.subr.bf16.mxu0 %v1120_v18 }
  0x5d   :  { %957 = vmatpush3.bf16.msra.mxu0 %v1120_v18 }
  0x5e   :  { %958 = vmatprep.subr.bf16.mxu0 %v1122_v24 }
  0x60   :  { %919 = vmatmul.mubr.bf16.gmra.mrb[4].mxu0 %v1315_v19 }
  0x61   :  { %922 = vmatprep.mubr.bf16.mxu0 %v1317_v20  ;;  %959 = vmatpush3.bf16.msra.mxu0 %v1122_v24 }
  0x62   :  { %960 = vmatprep.subr.bf16.mxu0 %v1124_v26 }
  0x65   :  { %961 = vmatpush3.bf16.msra.mxu0 %v1124_v26 }
  0x66   :  { %962 = vmatprep.subr.bf16.mxu0 %v1126_v28 }
  0x68   :  { %923 = vmatmul.mubr.bf16.gmra.mrb[8].mxu0 %v1321_v21 }
  0x69   :  { %926 = vmatprep.mubr.bf16.mxu0 %v1323_v22  ;;  %963 = vmatpush3.bf16.msra.mxu0 %v1126_v28 }
  0x6a   :  { %964 = vmatprep.subr.bf16.mxu0 %v1127_v29 }
  0x6d   :  { %965 = vmatpush3.bf16.msra.mxu0 %v1127_v29  ;;  %v103_v29 = vld [vmem:[#allocation7 + $0x70] sm:$0xff] }
  0x6e   :  { %966 = vmatprep.subr.bf16.mxu0 %v1128_v30 }
  0x70   :  { %927 = vmatmul.mubr.bf16.gmra.mrb[12].mxu0 %v1327_v23 }
  0x71   :  { %967 = vmatpush3.bf16.msra.mxu0 %v1128_v30 }
  0x72   :  { %968 = vmatprep.subr.bf16.mxu0 %v1129_v31 }
  0x75   :  { %969 = vmatpush3.bf16.msra.mxu0 %v1129_v31  ;;  %v101_v31 = vld [vmem:[#allocation7 + $0x60] sm:$0xff] }
 0x12b   :  { %v916_v34 = vpop.f32.mrb[0].mxu0 }
 0x12c   :  { %v244_v36 = vadd.f32 %v916_v34, %v91_v32  ;;  %v235_v37 = vpop.f32.mrb[1].mxu0  ;;  %v104_v34 = vld [vmem:[#allocation7 + $0x78] sm:$0xff] }
 0x12d   :  { %v236_v39 = vadd.f32 %v235_v37, %v89_v33  ;;  %v917_v40 = vpop.f32.mrb[2].mxu0  ;;  %v102_v37 = vld [vmem:[#allocation7 + $0x68] sm:$0xff] }
 0x12e   :  { %v247_v41 = vadd.f32 %v917_v40, %v92_v35  ;;  %v238_v42 = vpop.f32.mrb[3].mxu0  ;;  %v300_v44 = vmax.f32 %v244_v36, 0.0 }
 0x12f   :  { %v239_v43 = vadd.f32 %v238_v42, %v90_v38  ;;  %v298_v46 = vmax.f32 %v236_v39, 0.0 }
 0x130   :  { %v301_v45 = vmax.f32 %v247_v41, 0.0 }
 0x131   :  { %v299_v47 = vmax.f32 %v239_v43, 0.0 }
 0x132   :  { %v315_v49 = vpack.c.bf16 %v301_v45, %v300_v44 }
 0x133   :  { %v920_v51 = vpop.f32.mrb[4].mxu0  ;;  %v314_v53 = vpack.c.bf16 %v299_v47, %v298_v46 }
 0x134   :  { %v260_v54 = vadd.f32 %v920_v51, %v95_v48  ;;  %v251_v55 = vpop.f32.mrb[5].mxu0 }
 0x135   :  { %v252_v57 = vadd.f32 %v251_v55, %v93_v50  ;;  %v921_v58 = vpop.f32.mrb[6].mxu0  ;;  %946 = vmatprep.mubr.bf16.mxu1 %v314_v53 }
 0x136   :  { %v263_v59 = vadd.f32 %v921_v58, %v96_v52  ;;  %v254_v60 = vpop.f32.mrb[7].mxu0  ;;  %947 = vmatmul.mubr.bf16.vlgmr.msra.gmra.mrb[0].mxu1 %v315_v49  ;;  %v304_v62 = vmax.f32 %v260_v54, 0.0 }
 0x137   :  { %v255_v61 = vadd.f32 %v254_v60, %v94_v56  ;;  %v302_v0 = vmax.f32 %v252_v57, 0.0 }
 0x138   :  { %v305_v63 = vmax.f32 %v263_v59, 0.0 }
 0x139   :  { %v303_v1 = vmax.f32 %v255_v61, 0.0 }
 0x13a   :  { %v317_v3 = vpack.c.bf16 %v305_v63, %v304_v62 }
 0x13b   :  { %v316_v7 = vpack.c.bf16 %v303_v1, %v302_v0  ;;  %v924_v8 = vpop.f32.mrb[8].mxu0 }
 0x13c   :  { %v276_v10 = vadd.f32 %v924_v8, %v99_v2  ;;  %v267_v11 = vpop.f32.mrb[9].mxu0 }
 0x13d   :  { %v268_v13 = vadd.f32 %v267_v11, %v97_v5  ;;  %v925_v15 = vpop.f32.mrb[10].mxu0  ;;  %950 = vmatprep.mubr.bf16.mxu1 %v316_v7  ;;  %v584_v11 = vunpack.c.l.bf16 %v1309_v14 }
 0x13e   :  { %v279_v17 = vadd.f32 %v925_v15, %v100_v9  ;;  %v270_v18 = vpop.f32.mrb[11].mxu0  ;;  %951 = vmatmul.mubr.bf16.gmra.mrb[4].mxu1 %v317_v3  ;;  %v308_v25 = vmax.f32 %v276_v10, 0.0  ;;  %v583_v10 = vunpack.c.h.bf16 %v1306_v4  ;;  %v587_v15 = vunpack.c.h.bf16 %v1311_v16 }
 0x13f   :  { %v271_v24 = vadd.f32 %v270_v18, %v98_v12  ;;  %1010 = vmatprep.mubr.f32.mxu1 %v582_v6  ;;  %v306_v27 = vmax.f32 %v268_v13, 0.0  ;;  %v585_v12 = vunpack.c.h.bf16 %v1309_v14  ;;  %v586_v13 = vunpack.c.l.bf16 %v1311_v16 }
 0x140   :  { %v309_v26 = vmax.f32 %v279_v17, 0.0  ;;  %v588_v17 = vunpack.c.l.bf16 %v1315_v19  ;;  %v589_v18 = vunpack.c.h.bf16 %v1315_v19  ;;  %v590_v4 = vunpack.c.l.bf16 %v1317_v20 }
 0x141   :  { %v307_v28 = vmax.f32 %v271_v24, 0.0  ;;  %v591_v24 = vunpack.c.h.bf16 %v1317_v20  ;;  %v592_v14 = vunpack.c.l.bf16 %v1321_v21  ;;  %v594_v16 = vunpack.c.l.bf16 %v1323_v22  ;;  %v600_v20 = vld [vmem:[#allocation7 + $0x88] sm:$0xff] }
 0x142   :  { %v319_v30 = vpack.c.bf16 %v309_v26, %v308_v25  ;;  %v593_v25 = vunpack.c.h.bf16 %v1321_v21  ;;  %v595_v26 = vunpack.c.h.bf16 %v1323_v22  ;;  %v596_v19 = vunpack.c.l.bf16 %v1327_v23  ;;  %v599_v21 = vld [vmem:[#allocation7 + $0x80] sm:$0xff] }
 0x143   :  { %v318_v32 = vpack.c.bf16 %v307_v28, %v306_v27  ;;  %v928_v33 = vpop.f32.mrb[12].mxu0  ;;  %v597_v27 = vunpack.c.h.bf16 %v1327_v23  ;;  %v608_v28 = vld [vmem:[#allocation7 + $0xc8] sm:$0xff] }
 0x144   :  { %v292_v35 = vadd.f32 %v928_v33, %v103_v29  ;;  %v283_v36 = vpop.f32.mrb[13].mxu0  ;;  %v1066_v29 = vadd.f32 %v608_v28, %v600_v20 }
 0x145   :  { %v284_v38 = vadd.f32 %v283_v36, %v101_v31  ;;  %v929_v39 = vpop.f32.mrb[14].mxu0  ;;  %970 = vmatprep.mubr.bf16.mxu0 %v318_v32  ;;  %v610_v31 = vld [vmem:[#allocation7 + $0xd8] sm:$0xff] }
 0x146   :  { %v295_v40 = vadd.f32 %v929_v39, %v104_v34  ;;  %v286_v41 = vpop.f32.mrb[15].mxu0  ;;  %971 = vmatmul.mubr.bf16.vlgmr.msra.gmra.mrb[16].mxu0 %v319_v30  ;;  %v312_v43 = vmax.f32 %v292_v35, 0.0  ;;  %v602_v30 = vld [vmem:[#allocation7 + $0x98] sm:$0xff]  ;;  %v607_v35 = vld [vmem:[#allocation7 + $0xc0] sm:$0xff]  ;;  %v601_v39 = vld [vmem:[#allocation7 + $0x90] sm:$0xff] }
 0x147   :  { %v287_v42 = vadd.f32 %v286_v41, %v102_v37  ;;  %v310_v45 = vmax.f32 %v284_v38, 0.0  ;;  %v1070_v36 = vadd.f32 %v610_v31, %v602_v30  ;;  %v604_v37 = vld [vmem:[#allocation7 + $0xa8] sm:$0xff] }
 0x148   :  { %v313_v44 = vmax.f32 %v295_v40, 0.0  ;;  %v612_v38 = vld [vmem:[#allocation7 + $0xe8] sm:$0xff] }
 0x149   :  { %v311_v46 = vmax.f32 %v287_v42, 0.0 }
 0x14a   :  { %v321_v47 = vpack.c.bf16 %v313_v44, %v312_v43  ;;  %v609_v43 = vld [vmem:[#allocation7 + $0xd0] sm:$0xff]  ;;  %v1074_v44 = vadd.f32 %v612_v38, %v604_v37 }
 0x14b   :  { %v320_v48 = vpack.c.bf16 %v311_v46, %v310_v45  ;;  %v606_v46 = vld [vmem:[#allocation7 + $0xb8] sm:$0xff] }
 0x14d   :  { %974 = vmatprep.mubr.bf16.mxu0 %v320_v48  ;;  %v603_v48 = vld [vmem:[#allocation7 + $0xa0] sm:$0xff] }
 0x14e   :  { %975 = vmatmul.mubr.bf16.gmra.mrb[20].mxu0 %v321_v47  ;;  %v614_v47 = vld [vmem:[#allocation7 + $0xf8] sm:$0xff] }
 0x209   :  { %v948_v49 = vpop.f32.mrb[0].mxu1 }
 0x20a   :  { %v421_v50 = vpop.f32.mrb[1].mxu1 }
 0x20b   :  { %v949_v51 = vpop.f32.mrb[2].mxu1 }
 0x20c   :  { %v1038_v52 = vpack.c.bf16 %v949_v51, %v948_v49  ;;  %v424_v53 = vpop.f32.mrb[3].mxu1 }
 0x20d   :  { %v1034_v54 = vpack.c.bf16 %v424_v53, %v421_v50  ;;  %v611_v53 = vld [vmem:[#allocation7 + $0xe0] sm:$0xff] }
 0x20f   :  { %1035 = vmatprep.subr.bf16.mxu1 %v1034_v54 }
 0x210   :  { %1037 = vmatpush3.bf16.msra.mxu1 %v1034_v54  ;;  %v1078_v54 = vadd.f32 %v614_v47, %v606_v46 }
 0x211   :  { %v952_v55 = vpop.f32.mrb[4].mxu1  ;;  %1039 = vmatprep.subr.bf16.mxu1 %v1038_v52 }
 0x212   :  { %v437_v56 = vpop.f32.mrb[5].mxu1 }
 0x213   :  { %v953_v57 = vpop.f32.mrb[6].mxu1 }
 0x214   :  { %v1046_v58 = vpack.c.bf16 %v953_v57, %v952_v55  ;;  %v440_v59 = vpop.f32.mrb[7].mxu1  ;;  %1041 = vmatpush3.bf16.msra.mxu1 %v1038_v52 }
 0x215   :  { %v1042_v60 = vpack.c.bf16 %v440_v59, %v437_v56  ;;  %v605_v56 = vld [vmem:[#allocation7 + $0xb0] sm:$0xff] }
 0x217   :  { %1043 = vmatprep.subr.bf16.mxu1 %v1042_v60 }
 0x218   :  { %1045 = vmatpush3.bf16.msra.mxu1 %v1042_v60 }
 0x219   :  { %v972_v61 = vpop.f32.mrb[16].mxu0  ;;  %1047 = vmatprep.subr.bf16.mxu1 %v1046_v58 }
 0x21a   :  { %v551_v62 = vpop.f32.mrb[17].mxu0 }
 0x21b   :  { %v973_v63 = vpop.f32.mrb[18].mxu0 }
 0x21c   :  { %v1054_v0 = vpack.c.bf16 %v973_v63, %v972_v61  ;;  %v554_v1 = vpop.f32.mrb[19].mxu0  ;;  %1049 = vmatpush3.bf16.msra.mxu1 %v1046_v58  ;;  %v613_v61 = vld [vmem:[#allocation7 + $0xf0] sm:$0xff] }
 0x21d   :  { %v1050_v2 = vpack.c.bf16 %v554_v1, %v551_v62 }
 0x21f   :  { %1051 = vmatprep.subr.bf16.mxu1 %v1050_v2 }
 0x220   :  { %1053 = vmatpush3.bf16.msra.mxu1 %v1050_v2 }
 0x221   :  { %v976_v3 = vpop.f32.mrb[20].mxu0  ;;  %1055 = vmatprep.subr.bf16.mxu1 %v1054_v0 }
 0x222   :  { %v567_v5 = vpop.f32.mrb[21].mxu0 }
 0x223   :  { %v977_v6 = vpop.f32.mrb[22].mxu0 }
 0x224   :  { %v1062_v7 = vpack.c.bf16 %v977_v6, %v976_v3  ;;  %v570_v8 = vpop.f32.mrb[23].mxu0  ;;  %1057 = vmatpush3.bf16.msra.mxu1 %v1054_v0 }
 0x225   :  { %v1058_v9 = vpack.c.bf16 %v570_v8, %v567_v5 }
 0x227   :  { %1059 = vmatprep.subr.bf16.mxu1 %v1058_v9 }
 0x228   :  { %1061 = vmatpush3.bf16.msra.mxu1 %v1058_v9 }
 0x229   :  { %1063 = vmatprep.subr.bf16.mxu1 %v1062_v7 }
 0x22c   :  { %1065 = vmatpush3.bf16.msra.mxu1 %v1062_v7 }
 0x22f   :  { %1011 = vmatmul.mubr.f32.vlgmr.msra.gmra.mrb[8].mxu1 %v583_v10 }
 0x230   :  { %1013 = vmatprep.mubr.f32.mxu1 %v584_v11 }
 0x233   :  { %1014 = vmatmul.mubr.f32.gmra.mrb[10].mxu1 %v585_v12 }
 0x234   :  { %1016 = vmatprep.mubr.f32.mxu1 %v586_v13 }
 0x237   :  { %1017 = vmatmul.mubr.f32.gmra.mrb[12].mxu1 %v587_v15 }
 0x238   :  { %1019 = vmatprep.mubr.f32.mxu1 %v588_v17 }
 0x23b   :  { %1020 = vmatmul.mubr.f32.gmra.mrb[14].mxu1 %v589_v18 }
 0x23c   :  { %1022 = vmatprep.mubr.f32.mxu1 %v590_v4 }
 0x23f   :  { %1023 = vmatmul.mubr.f32.gmra.mrb[8].mxu1 %v591_v24 }
 0x240   :  { %1025 = vmatprep.mubr.f32.mxu1 %v592_v14 }
 0x243   :  { %1026 = vmatmul.mubr.f32.gmra.mrb[10].mxu1 %v593_v25 }
 0x244   :  { %1028 = vmatprep.mubr.f32.mxu1 %v594_v16 }
 0x247   :  { %1029 = vmatmul.mubr.f32.gmra.mrb[12].mxu1 %v595_v26 }
 0x248   :  { %1031 = vmatprep.mubr.f32.mxu1 %v596_v19 }
 0x24b   :  { %1032 = vmatmul.mubr.f32.gmra.mrb[14].mxu1 %v597_v27 }
 0x312   :  { %v1024_v32 = vpop.f32.mrb[8].mxu1 }
 0x313   :  { %v1067_v33 = vadd.f32 %v1066_v29, %v1024_v32  ;;  %v721_v34 = vpop.f32.mrb[9].mxu1 }
 0x314   :  { %v1068_v22 = vadd.f32 %v721_v34, %v599_v21 }
 0x315   :  { %769 = vst [vmem:[#allocation8 + $0x8] sm:$0xff] %v1067_v33 }
 0x316   :  { %v1069_v40 = vadd.f32 %v1068_v22, %v607_v35  ;;  %v1027_v23 = vpop.f32.mrb[10].mxu1 }
 0x317   :  { %v1071_v41 = vadd.f32 %v1070_v36, %v1027_v23  ;;  %v731_v42 = vpop.f32.mrb[11].mxu1 }
 0x318   :  { %768 = vst [vmem:[#allocation8] sm:$0xff] %v1069_v40  ;;  %v1072_v45 = vadd.f32 %v731_v42, %v601_v39 }
 0x319   :  { %771 = vst [vmem:[#allocation8 + $0x18] sm:$0xff] %v1071_v41 }
 0x31a   :  { %v1073_v49 = vadd.f32 %v1072_v45, %v609_v43  ;;  %v1030_v50 = vpop.f32.mrb[12].mxu1 }
 0x31b   :  { %v1075_v51 = vadd.f32 %v1074_v44, %v1030_v50  ;;  %v741_v52 = vpop.f32.mrb[13].mxu1 }
 0x31c   :  { %770 = vst [vmem:[#allocation8 + $0x10] sm:$0xff] %v1073_v49  ;;  %v1076_v55 = vadd.f32 %v741_v52, %v603_v48 }
 0x31d   :  { %773 = vst [vmem:[#allocation8 + $0x28] sm:$0xff] %v1075_v51 }
 0x31e   :  { %v1077_v57 = vadd.f32 %v1076_v55, %v611_v53  ;;  %v1033_v58 = vpop.f32.mrb[14].mxu1 }
 0x31f   :  { %v1079_v59 = vadd.f32 %v1078_v54, %v1033_v58  ;;  %v751_v60 = vpop.f32.mrb[15].mxu1 }
 0x320   :  { %772 = vst [vmem:[#allocation8 + $0x20] sm:$0xff] %v1077_v57  ;;  %v1080_v62 = vadd.f32 %v751_v60, %v605_v56 }
 0x321   :  { %775 = vst [vmem:[#allocation8 + $0x38] sm:$0xff] %v1079_v59 }
 0x322   :  { %v1081_v63 = vadd.f32 %v1080_v62, %v613_v61 }
 0x324   :  { %774 = vst [vmem:[#allocation8 + $0x30] sm:$0xff] %v1081_v63 }
 0x325   :  { %1215 = shalt.err (!%p1212_p0)
}
 0x326   :  { %s1216_s27 = scalar_lea.hbm %s1364_s3, 1024 }
 0x327   :  { %p1217_p1 = scmp.ne.s32.totalorder %s1364_s3, %s1216_s27  ;;  %p1220_p2 = scmp.lt.u32.totalorder %s1216_s27, %s1364_s3 }
 0x329   :  { %p1222_p3 = pnand %p1220_p2, %p1217_p1 }
 0x32b   :  { %1225 = shalt.err (!%p1222_p3)
}
 0x32c   :  { %787 = dma.vmem_to_hbm [thread:$0]  %s782_s23, 1024, %s1364_s3, [#allocation4], %s1237_s0, %s1237_s0, %s1238_s15  }
 0x32d   :  { %1230 = dma.done.wait [#allocation4], 1024  }
 0x32e   :  { %1231 = vsyncadd [#allocation4], 4294966272 }
 0x32f   :  { %791 = vsyncpa [#allocation3], 1 }
 0x330   :  { %792 = vsyncpa [#allocation6], 1 }
 0x331   :  { %793 = vsyncpa [#allocation4], 1 }

</bundles_post_ra>
